<compile_context>
chip_gen: v7x
topology: tpu7x:2x2x1
jax: 0.10.0
libtpu: 0.0.40
codegen_flags: <defaults>
</compile_context>

<pallas_src>
import jax
import jax.numpy as jnp
from jax.experimental import pallas as pl
from jax.experimental.pallas import tpu as pltpu


def _roll_lane_kernel(shift_ref, x_ref, o_ref):
    """Roll one (bt, seq) tile along the lane (seq) axis by a dynamic shift.

    shift_ref : SMEM (1,) int32 (scalar prefetch); already reduced mod seq.
    x_ref     : VMEM (bt, seq) input tile.
    o_ref     : VMEM (bt, seq) output tile.

    out[b, j] = x[b, (j - s) mod seq]  ==  roll by +s, i.e. jnp.roll semantics.
    The rotate rides the XLU slot; the kernel is 1 load + 1 rotate + 1 store.
    """
    o_ref[...] = pltpu.roll(x_ref[...], shift_ref[0], axis=1)


def _round_up(v: int, m: int) -> int:
    return ((v + m - 1) // m) * m


def _pick_batch_block(batch: int, seq: int, itemsize: int) -> int:
    """Sublane (batch) tile rows for a (bt, seq) block.

    Goals (perf review):
      * multiple of 8 sublanes (or the full batch when batch < 8),
      * per-step VMEM (double-buffered in + out ~= 4*bt*seq*itemsize) stays
        well under v5e's 16 MiB default scoped VMEM (headroom on v6e/v7x),
      * for large batches aim for >= ~8 grid steps (DMA overlap + v7x 2-TC
        sharding) while keeping each block >= ~512 KiB so the ~0.35 us/step
        overhead stays amortized.
    """
    if batch <= 8:
        return batch                           # full dim: allowed by the (8,128) rule
    per_row = seq * itemsize
    vmem_rows = max(8, ((8 << 20) // (4 * per_row)) // 8 * 8)        # VMEM budget cap
    step_rows = max(8, (batch // 8) // 8 * 8)                        # ~8 grid steps
    block_floor = max(8, _round_up(-(-(512 << 10) // per_row), 8))   # ~512 KiB blocks
    bt = min(vmem_rows, max(step_rows, block_floor))
    return min(bt, _round_up(batch, 8))


def random_shift(x, shift):
    """out[b, j] = x[b, (j - shift) mod seq]  (== jnp.roll(x, shift, axis=1))."""
    assert x.ndim == 2, "random_shift expects a (batch, seq) array"
    batch, seq = x.shape

    if seq % 128 != 0:
        # TODO(synk): dynamic lane rotate needs a lane-aligned (multiple-of-128)
        # seq; ragged sequence lengths fall back to XLA's roll.
        return jnp.roll(x, shift, axis=1)

    itemsize = jnp.dtype(x.dtype).itemsize
    bt = _pick_batch_block(batch, seq, itemsize)
    # Reduce mod seq on the host/XLA side: keeps the in-kernel scalar path
    # trivial and makes negative shifts well-defined (jnp.mod is non-negative).
    shift_arr = jnp.mod(jnp.asarray(shift, dtype=jnp.int32), seq).reshape((1,))

    return pl.pallas_call(
        _roll_lane_kernel,
        out_shape=jax.ShapeDtypeStruct((batch, seq), x.dtype),
        grid_spec=pltpu.PrefetchScalarGridSpec(
            num_scalar_prefetch=1,
            grid=(pl.cdiv(batch, bt),),
            in_specs=[pl.BlockSpec((bt, seq), lambda i, shift_ref: (i, 0))],
            out_specs=pl.BlockSpec((bt, seq), lambda i, shift_ref: (i, 0)),
        ),
        compiler_params=pltpu.CompilerParams(
            dimension_semantics=("parallel",),   # independent batch tiles -> megacore
        ),
        cost_estimate=pl.CostEstimate(
            flops=0,
            transcendentals=0,
            bytes_accessed=2 * x.size * itemsize,   # pure data movement: 1 read + 1 write
        ),
    )(shift_arr, x)


class RandomShift:
    """JAX/Pallas port of the PyTorch RandomShift module (dict-in / dict-out)."""

    def __init__(self, max_fraction_train, key_in, key_out, max_fraction_eval=0.0):
        self._max_fraction_train = float(max_fraction_train)
        self._max_fraction_eval = float(max_fraction_eval)
        self._key_in = key_in
        self._key_out = key_out
        self.training = True

    def __call__(self, batch_dict, rng_key):
        x = batch_dict[self._key_in]
        frac = self._max_fraction_train if self.training else self._max_fraction_eval
        seq = x.shape[-1]
        max_shift = int(seq * frac)
        if frac > 0.0 and max_shift > 0:
            # Host-side random scalar, analogous to np.random.randint(0, max_shift).
            shift = jax.random.randint(rng_key, (), 0, max_shift, dtype=jnp.int32)
            batch_dict[self._key_out] = random_shift(x, shift)
        else:
            # Identity path: skip the kernel entirely (JAX arrays are immutable,
            # so no clone is needed).
            batch_dict[self._key_out] = x
        return batch_dict


if __name__ == "__main__":
    key = jax.random.PRNGKey(0)
    k_x, k_shift = jax.random.split(key)

    batch, seq = 8, 128                          # small, (8,128)-tile-friendly example
    x = jax.random.randint(k_x, (batch, seq), minval=1, maxval=1000, dtype=jnp.int32)

    # --- direct kernel check against jnp.roll for a fixed shift ---
    out_fixed = jax.block_until_ready(random_shift(x, 5))
    assert out_fixed.shape == x.shape and out_fixed.dtype == x.dtype
    assert bool(jnp.array_equal(out_fixed, jnp.roll(x, 5, axis=1))), "fixed-shift roll mismatch"

    # --- training mode: random roll ---
    frac = 0.25
    module = RandomShift(max_fraction_train=frac, key_in="tokens",
                         key_out="tokens_shifted")
    out = jax.block_until_ready(module({"tokens": x}, rng_key=k_shift)["tokens_shifted"])

    max_shift = int(seq * frac)
    shift = jax.random.randint(k_shift, (), 0, max_shift, dtype=jnp.int32)
    expected = jnp.roll(x, shift, axis=1)        # pure-JAX reference
    assert out.shape == x.shape and out.dtype == x.dtype
    assert bool(jnp.array_equal(out, expected)), "rolled output mismatch"

    # --- eval mode: max_fraction_eval=0.0 -> identity (kernel short-circuited) ---
    module.training = False
    out_eval = jax.block_until_ready(module({"tokens": x}, rng_key=k_shift)["tokens_shifted"])
    assert bool(jnp.array_equal(out_eval, x)), "eval-mode output should be unchanged"

    print("KERNEL_OK")
</pallas_src>

<mosaic_0001>
module attributes {stable_mosaic.version = 11 : i64} {
  func.func @_roll_lane_kernel(%arg0: i32, %arg1: memref<1xi32, #tpu.memory_space<smem>>, %arg2: memref<8x128xi32, #tpu.memory_space<vmem>>, %arg3: memref<8x128xi32, #tpu.memory_space<vmem>>) attributes {dimension_semantics = [#tpu.dimension_semantics<parallel>], iteration_bounds = array<i64: 1>, scalar_prefetch = 1 : i64, scratch_operands = 0 : i64, tpu.core_type = #tpu.core_type<tc>, window_params = [{transform_indices = @transform_0, window_bounds = array<i64: 8, 128>}, {transform_indices = @transform_1, window_bounds = array<i64: 8, 128>}]} {
    %c0 = arith.constant 0 : index
    %c0_0 = arith.constant 0 : index
    %0 = vector.load %arg2[%c0, %c0_0] : memref<8x128xi32, #tpu.memory_space<vmem>>, vector<8x128xi32>
    %c0_1 = arith.constant 0 : index
    %1 = memref.load %arg1[%c0_1] : memref<1xi32, #tpu.memory_space<smem>>
    %2 = tpu.dynamic_rotate %0 by %1 dim 1 : vector<8x128xi32>, i32 -> vector<8x128xi32>
    %c0_2 = arith.constant 0 : index
    %c0_3 = arith.constant 0 : index
    %3 = vector.load %arg3[%c0_2, %c0_3] : memref<8x128xi32, #tpu.memory_space<vmem>>, vector<8x128xi32>
    tpu.vector_store %arg3[%c0_2, %c0_3], %2 {strides = array<i32>} : memref<8x128xi32, #tpu.memory_space<vmem>>, vector<8x128xi32>,
    return
  }
  func.func @transform_0(%arg0: i32, %arg1: memref<1xi32, #tpu.memory_space<smem>>) -> (i32, i32) {
    %c0_i32 = arith.constant 0 : i32
    %c0_i32_0 = arith.constant 0 : i32
    return %arg0, %c0_i32 : i32, i32
  }
  func.func @transform_1(%arg0: i32, %arg1: memref<1xi32, #tpu.memory_space<smem>>) -> (i32, i32) {
    %c0_i32 = arith.constant 0 : i32
    %c0_i32_0 = arith.constant 0 : i32
    return %arg0, %c0_i32 : i32, i32
  }
}

</mosaic_0001>

<bundles_post_ra>
// kernel: tpu_custom_call.1
= control target key start
LH: loop header
LB: loop body
LE: loop exit
PB: predicated region body
PF: predicated region fallthrough
CT: control target
= control target key end

     0   :  { %8 = vsyncpa [#allocation5], 0  ;;  %s139_s0 = inlined_call_operand.<no memory space> [shape: s32[1], index: 0, kind: input, shape index: {}]   ;;  %s140_s1 = inlined_call_operand.hbm [shape: s32[8,128], index: 1, kind: input, shape index: {}]   ;;  %s141_s2 = inlined_call_operand.hbm [shape: s32[8,128], index: 2, kind: output, shape index: {}]  }
   0x1   :  { %9 = vsyncpa [#allocation6], 0  ;;  %s95_s9 = smov [#allocation4]   ;;  %s47_s13 = scalar_lea.hbm %s140_s1, 128 }
   0x2   :  { %s16_s10 = sshll.u32 %s95_s9, 4  ;;  %p48_p0 = scmp.ne.s32.totalorder %s140_s1, %s47_s13  ;;  %s17_s10 = int_to_ptr.vmem [resolvable:$true] %s16_s10 }
   0x3   :  { %p51_p1 = scmp.lt.u32.totalorder %s47_s13, %s140_s1 }
   0x5   :  { %p53_p2 = pnand %p51_p1, %p48_p0 }
   0x7   :  { %56 = shalt.err (!%p53_p2)
}
   0x8   :  { %s57_s18 = scalar_lea.vmem %s17_s10, 128  ;;  %p62_p4 = scmp.lt.s32.totalorder %s17_s10, %s17_s10 }
   0x9   :  { %p58_p3 = scmp.ne.s32.totalorder %s17_s10, %s57_s18  ;;  %p63_p5 = scmp.lt.s32.totalorder %s57_s18, %s57_s18 }
   0xb   :  { %p64_p6 = por %p63_p5, %p62_p4 }
   0xd   :  { %p65_p7 = pnand %p64_p6, %p58_p3 }
   0xf   :  { %68 = shalt.err (!%p65_p7)
}
  0x10   :  { %19 = dma.hbm_to_vmem [thread:$0]  %s140_s1, 128, %s17_s10, [#allocation5]  }
  0x11   :  { %91 = dma.done.wait [#allocation5], 128  }
  0x12   :  { %92 = vsyncadd [#allocation5], 4294967168  ;;  %s25_s23 = sand.u32 127, %s139_s0   ;;  %v23_v0 = vld [vmem:[#allocation4] sm:$0xff]  ;;  %s96_s24 = smov [#allocation7]  }
  0x13   :  { %27 = vrot.lane.b32.xlu0 %v23_v0, %s25_s23  ;;  %s36_s25 = sshll.u32 %s96_s24, 4  ;;  %s37_s25 = int_to_ptr.vmem [resolvable:$true] %s36_s25 }
  0x14   :  { %s69_s26 = scalar_lea.vmem %s37_s25, 128  ;;  %p74_p9 = scmp.lt.s32.totalorder %s37_s25, %s37_s25 }
  0x15   :  { %p70_p8 = scmp.ne.s32.totalorder %s37_s25, %s69_s26  ;;  %p75_p10 = scmp.lt.s32.totalorder %s69_s26, %s69_s26 }
  0x17   :  { %p76_p11 = por %p75_p10, %p74_p9 }
  0x19   :  { %p77_p12 = pnand %p76_p11, %p70_p8 }
  0x85   :  { %v28_v1 = vpop.permute.xlu0 %27 }
  0x86   :  { %29 = vst [vmem:[#allocation7] sm:$0xff] %v28_v1 }
  0x87   :  { %80 = shalt.err (!%p77_p12)
}
  0x88   :  { %s81_s28 = scalar_lea.hbm %s141_s2, 128 }
  0x89   :  { %p82_p13 = scmp.ne.s32.totalorder %s141_s2, %s81_s28  ;;  %p85_p0 = scmp.lt.u32.totalorder %s81_s28, %s141_s2 }
  0x8b   :  { %p87_p1 = pnand %p85_p0, %p82_p13 }
  0x8d   :  { %90 = shalt.err (!%p87_p1)
}
  0x8e   :  { %39 = dma.vmem_to_hbm [thread:$0]  %s37_s25, 128, %s141_s2, [#allocation6]  }
  0x8f   :  { %93 = dma.done.wait [#allocation6], 128  }
  0x90   :  { %94 = vsyncadd [#allocation6], 4294967168 }
  0x91   :  { %43 = vsyncpa [#allocation5], 1 }
  0x92   :  { %44 = vsyncpa [#allocation6], 1 }

</bundles_post_ra>
